<compile_context>
chip_gen: v7x
topology: tpu7x:2x2x1
jax: 0.10.0
libtpu: 0.0.40
codegen_flags: <defaults>
</compile_context>

<pallas_src>
from typing import NamedTuple

import jax
import jax.numpy as jnp
from jax.experimental import pallas as pl
from jax.experimental.pallas import tpu as pltpu


def _round_up(n, m):
    return ((n + m - 1) // m) * m


class PolicyParams(NamedTuple):
    w1p: jax.Array  # [D, Hp]   fc1 weight, hidden padded to a multiple of 128
    b1p: jax.Array  # [1, Hp]   fc1 bias (f32)
    w2p: jax.Array  # [Hp, 1]   fc2 weight column (f32)
    b2s: jax.Array  # [1]       fc2 bias scalar (f32, lives in SMEM)


def prepare_params(w1, b1, w2, b2, *, dtype=jnp.float32):
    """One-time layout prep (hoisted out of the forward pass).

    w1: [D, H], b1: [H], w2: [H, 1] (or [H]), b2: [1]  --  PyTorch fc weights
    stored as [in, out].  `dtype` controls the streaming dtype of w1; pass
    jnp.bfloat16 together with bf16 activations to halve HBM traffic on v5e.
    """
    D, H = w1.shape
    Hp = _round_up(H, 128)
    f32 = jnp.float32
    w1p = jnp.zeros((D, Hp), dtype).at[:, :H].set(w1.astype(dtype))
    b1p = jnp.zeros((1, Hp), f32).at[:, :H].set(b1.reshape(1, H).astype(f32))
    w2p = jnp.zeros((Hp, 1), f32).at[:H, :].set(w2.reshape(H, 1).astype(f32))
    b2s = b2.reshape(1).astype(f32)
    return PolicyParams(w1p, b1p, w2p, b2s)


def policy_net_kernel(x_ref, w1_ref, b1_ref, w2_ref, b2_ref, out_ref):
    # fc1 on the MXU: [TB, D] @ [D, Hp] -> [TB, Hp], f32 accumulate (native
    # orientation: small resident weights, long streaming LHS).
    h = jnp.dot(x_ref[...], w1_ref[...], preferred_element_type=jnp.float32)
    # bias (sublane broadcast of [1, Hp]) + ReLU on the VPU.
    h = jnp.maximum(h + b1_ref[...], 0.0)
    # fc2 on the MXU: [TB, Hp] @ [Hp, 1] -> [TB, 1], again fully native (tiny
    # weight push, no transpose of h anywhere).
    y = jnp.dot(h, w2_ref[...], preferred_element_type=jnp.float32)
    y = y + b2_ref[0]  # scalar bias from SMEM
    # sigmoid(y) = 0.5 * (tanh(y/2) + 1): a single EUP transcendental.
    out_ref[...] = (0.5 * (jnp.tanh(0.5 * y) + 1.0)).astype(out_ref.dtype)


def _choose_tile(B, tile_b):
    if B <= 256:
        # Tiny batch: one sublane-aligned tile.
        return _round_up(B, 8)
    # At least two lane-aligned tiles so the "parallel" batch axis can span both
    # TensorCores on v7x (a no-op on v5e/v6e); cap at tile_b to bound VMEM
    # (each x buffer is lane-padded to tb * 128 * 4 bytes).
    half = _round_up(-(-B // 2), 128)
    return min(tile_b, half)


def policy_network_forward(x, params: PolicyParams, *, tile_b=2048):
    """Two-layer policy MLP forward.  x: [B, D]  ->  prob_up: [B, 1] float32."""
    B, D = x.shape
    Hp = params.w1p.shape[1]
    if x.dtype != params.w1p.dtype:
        # Don't mix dtypes in the fc1 dot (forces a VPU upcast of the x stream).
        raise ValueError(f"x dtype {x.dtype} must match prepared w1 dtype "
                         f"{params.w1p.dtype}; see prepare_params(dtype=...).")

    tb = _choose_tile(B, tile_b)
    num_tiles = pl.cdiv(B, tb)

    # Advisory cost so XLA can schedule/overlap this tiny custom call.
    itemsize = jnp.dtype(x.dtype).itemsize
    cost = pl.CostEstimate(
        flops=2 * B * D * Hp + 4 * B * Hp,
        transcendentals=B,
        bytes_accessed=B * D * itemsize + B * 4
        + D * Hp * jnp.dtype(params.w1p.dtype).itemsize + 2 * Hp * 4 + 4,
    )

    # TODO(synk): if the RL loop ever becomes HBM-bound on x (esp. v5e), feed x
    # and prepare_params in bfloat16; the MXU still accumulates in f32.
    out = pl.pallas_call(
        policy_net_kernel,
        out_shape=jax.ShapeDtypeStruct((B, 1), jnp.float32),
        grid=(num_tiles,),
        in_specs=[
            pl.BlockSpec((tb, D), lambda i: (i, 0)),              # x: streamed (ragged last tile OK)
            pl.BlockSpec((D, Hp), lambda i: (0, 0)),              # w1: resident
            pl.BlockSpec((1, Hp), lambda i: (0, 0)),              # b1: resident
            pl.BlockSpec((Hp, 1), lambda i: (0, 0)),              # w2 column: resident
            pl.BlockSpec(memory_space=pltpu.MemorySpace.SMEM),    # b2 scalar
        ],
        out_specs=pl.BlockSpec((tb, 1), lambda i: (i, 0)),
        compiler_params=pltpu.CompilerParams(
            dimension_semantics=("parallel",),
        ),
        cost_estimate=cost,
    )(x, params.w1p, params.b1p, params.w2p, params.b2s)
    return out


def init_params(key, input_size, hidden_size):
    """Deterministic init mimicking PyTorch nn.Linear defaults."""
    k1, k2, k3, k4 = jax.random.split(key, 4)
    bound1 = 1.0 / jnp.sqrt(input_size)
    bound2 = 1.0 / jnp.sqrt(hidden_size)
    w1 = jax.random.uniform(k1, (input_size, hidden_size), jnp.float32, -bound1, bound1)
    b1 = jax.random.uniform(k2, (hidden_size,), jnp.float32, -bound1, bound1)
    w2 = jax.random.uniform(k3, (hidden_size, 1), jnp.float32, -bound2, bound2)
    b2 = jax.random.uniform(k4, (1,), jnp.float32, -bound2, bound2)
    return w1, b1, w2, b2


if __name__ == "__main__":
    key = jax.random.PRNGKey(0)
    k_x, k_p, k_x2 = jax.random.split(key, 3)

    input_size = 16
    hidden_size = 32

    w1, b1, w2, b2 = init_params(k_p, input_size, hidden_size)
    params = prepare_params(w1, b1, w2, b2)   # hoisted, one-time layout prep

    def reference(x):
        h = jnp.maximum(x @ w1 + b1, 0.0)
        return jax.nn.sigmoid(h @ w2 + b2)

    # Small batch: single sublane-aligned tile.
    x_small = jax.random.normal(k_x, (8, input_size), jnp.float32)
    out_small = jax.block_until_ready(policy_network_forward(x_small, params))
    assert out_small.shape == (8, 1)
    assert jnp.max(jnp.abs(out_small - reference(x_small))) < 1e-4

    # Larger batch exercising multiple tiles + a ragged final tile
    # (tile_b=256, B=600 -> 3 tiles, last one only 88 valid rows).
    x_big = jax.random.normal(k_x2, (600, input_size), jnp.float32)
    out_big = jax.block_until_ready(
        policy_network_forward(x_big, params, tile_b=256))
    assert out_big.shape == (600, 1)
    assert jnp.max(jnp.abs(out_big - reference(x_big))) < 1e-4

    print("KERNEL_OK")
</pallas_src>

<mosaic_0001>
module attributes {stable_mosaic.version = 11 : i64} {
  func.func @policy_net_kernel(%arg0: i32, %arg1: memref<8x16xf32, #tpu.memory_space<vmem>>, %arg2: memref<16x128xf32, #tpu.memory_space<vmem>>, %arg3: memref<1x128xf32, #tpu.memory_space<vmem>>, %arg4: memref<128x1xf32, #tpu.memory_space<vmem>>, %arg5: memref<1xf32, #tpu.memory_space<smem>>, %arg6: memref<8x1xf32, #tpu.memory_space<vmem>>) attributes {dimension_semantics = [#tpu.dimension_semantics<parallel>], iteration_bounds = array<i64: 1>, scalar_prefetch = 0 : i64, scratch_operands = 0 : i64, tpu.core_type = #tpu.core_type<tc>, window_params = [{transform_indices = @transform_0, window_bounds = array<i64: 8, 16>}, {pipeline_mode = #tpu.pipeline_mode<synchronous>, transform_indices = @transform_1, window_bounds = array<i64: 16, 128>}, {pipeline_mode = #tpu.pipeline_mode<synchronous>, transform_indices = @transform_2, window_bounds = array<i64: 1, 128>}, {pipeline_mode = #tpu.pipeline_mode<synchronous>, transform_indices = @transform_3, window_bounds = array<i64: 128, 1>}, {transform_indices = @transform_4, window_bounds = array<i64: 1>}, {transform_indices = @transform_5, window_bounds = array<i64: 8, 1>}]} {
    %c0 = arith.constant 0 : index
    %c0_0 = arith.constant 0 : index
    %0 = vector.load %arg1[%c0, %c0_0] : memref<8x16xf32, #tpu.memory_space<vmem>>, vector<8x16xf32>
    %c0_1 = arith.constant 0 : index
    %c0_2 = arith.constant 0 : index
    %1 = vector.load %arg2[%c0_1, %c0_2] : memref<16x128xf32, #tpu.memory_space<vmem>>, vector<16x128xf32>
    %cst = arith.constant dense<0.000000e+00> : vector<8x128xf32>
    %2 = tpu.matmul %0, %1, %cst {dimension_numbers = #tpu.dot_dimension_numbers<[1], [0], [0], [1], [0, 0, 1, 1], [], []>} : vector<8x16xf32>, vector<16x128xf32>, vector<8x128xf32> -> vector<8x128xf32>
    %c0_3 = arith.constant 0 : index
    %c0_4 = arith.constant 0 : index
    %3 = vector.load %arg3[%c0_3, %c0_4] : memref<1x128xf32, #tpu.memory_space<vmem>>, vector<1x128xf32>
    %4 = vector.broadcast %3 : vector<1x128xf32> to vector<8x128xf32>
    %5 = arith.addf %2, %4 : vector<8x128xf32>
    %cst_5 = arith.constant 0.000000e+00 : f32
    %6 = vector.broadcast %cst_5 : f32 to vector<8x128xf32>
    %7 = arith.maximumf %5, %6 : vector<8x128xf32>
    %c0_6 = arith.constant 0 : index
    %c0_7 = arith.constant 0 : index
    %8 = vector.load %arg4[%c0_6, %c0_7] : memref<128x1xf32, #tpu.memory_space<vmem>>, vector<128x1xf32>
    %cst_8 = arith.constant dense<0.000000e+00> : vector<8x1xf32>
    %9 = tpu.matmul %7, %8, %cst_8 {dimension_numbers = #tpu.dot_dimension_numbers<[1], [0], [0], [1], [0, 0, 1, 1], [], []>} : vector<8x128xf32>, vector<128x1xf32>, vector<8x1xf32> -> vector<8x1xf32>
    %c0_9 = arith.constant 0 : index
    %10 = memref.load %arg5[%c0_9] : memref<1xf32, #tpu.memory_space<smem>>
    %11 = vector.broadcast %10 : f32 to vector<8x1xf32>
    %12 = arith.addf %9, %11 : vector<8x1xf32>
    %cst_10 = arith.constant 5.000000e-01 : f32
    %13 = vector.broadcast %cst_10 : f32 to vector<8x1xf32>
    %14 = arith.mulf %13, %12 : vector<8x1xf32>
    %15 = math.tanh %14 : vector<8x1xf32>
    %cst_11 = arith.constant 1.000000e+00 : f32
    %16 = vector.broadcast %cst_11 : f32 to vector<8x1xf32>
    %17 = arith.addf %15, %16 : vector<8x1xf32>
    %cst_12 = arith.constant 5.000000e-01 : f32
    %18 = vector.broadcast %cst_12 : f32 to vector<8x1xf32>
    %19 = arith.mulf %18, %17 : vector<8x1xf32>
    %c0_13 = arith.constant 0 : index
    %c0_14 = arith.constant 0 : index
    %20 = vector.load %arg6[%c0_13, %c0_14] : memref<8x1xf32, #tpu.memory_space<vmem>>, vector<8x1xf32>
    tpu.vector_store %arg6[%c0_13, %c0_14], %19 {strides = array<i32>} : memref<8x1xf32, #tpu.memory_space<vmem>>, vector<8x1xf32>,
    return
  }
  func.func @transform_0(%arg0: i32) -> (i32, i32) {
    %c0_i32 = arith.constant 0 : i32
    %c0_i32_0 = arith.constant 0 : i32
    return %arg0, %c0_i32 : i32, i32
  }
  func.func @transform_1(%arg0: i32) -> (i32, i32) {
    %c0_i32 = arith.constant 0 : i32
    %c0_i32_0 = arith.constant 0 : i32
    %c0_i32_1 = arith.constant 0 : i32
    return %c0_i32, %c0_i32_0 : i32, i32
  }
  func.func @transform_2(%arg0: i32) -> (i32, i32) {
    %c0_i32 = arith.constant 0 : i32
    %c0_i32_0 = arith.constant 0 : i32
    %c0_i32_1 = arith.constant 0 : i32
    return %c0_i32, %c0_i32_0 : i32, i32
  }
  func.func @transform_3(%arg0: i32) -> (i32, i32) {
    %c0_i32 = arith.constant 0 : i32
    %c0_i32_0 = arith.constant 0 : i32
    %c0_i32_1 = arith.constant 0 : i32
    return %c0_i32, %c0_i32_0 : i32, i32
  }
  func.func @transform_4(%arg0: i32) -> i32 {
    %c0_i32 = arith.constant 0 : i32
    %c0_i32_0 = arith.constant 0 : i32
    return %c0_i32 : i32
  }
  func.func @transform_5(%arg0: i32) -> (i32, i32) {
    %c0_i32 = arith.constant 0 : i32
    %c0_i32_0 = arith.constant 0 : i32
    return %arg0, %c0_i32 : i32, i32
  }
}

</mosaic_0001>

<bundles_post_ra>
// kernel: tpu_custom_call.1
= control target key start
LH: loop header
LB: loop body
LE: loop exit
PB: predicated region body
PF: predicated region fallthrough
CT: control target
= control target key end

     0   :  { %v300_v0 = vmov 0.0|0.0   ;;  %vm301_vm0 = vmmov 0   ;;  %v302_v3 = vmov 0.0   ;;  %vm31_vm1 = vcmask 130048   ;;  %s399_s1 = inlined_call_operand.vmem [shape: f32[16,128], index: 1, kind: input, shape index: {}]   ;;  %s400_s3 = inlined_call_operand.vmem [shape: f32[128,1], index: 3, kind: input, shape index: {}]   ;;  %s401_s0 = inlined_call_operand.vmem [shape: f32[8,16], index: 0, kind: input, shape index: {}]   ;;  %s402_s2 = inlined_call_operand.vmem [shape: f32[1,128], index: 2, kind: input, shape index: {}]   ;;  %s403_s4 = inlined_call_operand.<no memory space> [shape: f32[1], index: 4, kind: input, shape index: {}]   ;;  %s404_s5 = inlined_call_operand.vmem [shape: f32[8,1], index: 5, kind: output, shape index: {}]  }
   0x1   :  { %268 = vmatprep.subr.bf16.mxu0 %v300_v0  ;;  %v22_v1 = vld [vmem:[%s399_s1] sm:$0xff]  ;;  %v23_v2 = vld [vmem:[%s399_s1 + $0x8] sm:$0xff]  ;;  %230 = vmatprep.mubr.msk.f32.mxu0 %vm301_vm0, %v302_v3  ;;  %v108_v7 = vld [vmem:[%s400_s3 + $0x10] sm:$0xff]  ;;  %v123_v35 = vstv %s403_s4  ;;  %vm198_vm2 = vcmask 7168  }
   0x2   :  { %v269_v4 = vpack.c.bf16 %v23_v2, %v22_v1  ;;  %271 = vmatprep.subr.bf16.mxu1 %v300_v0  ;;  %v106_v5 = vld [vmem:[%s400_s3] sm:$0xff]  ;;  %v107_v6 = vld [vmem:[%s400_s3 + $0x8] sm:$0xff]  ;;  %265 = vmatprep.mubr.msk.f32.mxu1 %vm301_vm0, %v302_v3  ;;  %v109_v9 = vld [vmem:[%s400_s3 + $0x18] sm:$0xff] }
   0x3   :  { %v272_v8 = vpack.c.bf16 %v107_v6, %v106_v5  ;;  %v21_v10 = vld [vmem:[%s401_s0] sm:$0xff]  ;;  %v275_v11 = vpack.c.bf16 %v109_v9, %v108_v7  ;;  %v111_v13 = vld [vmem:[%s400_s3 + $0x28] sm:$0xff]  ;;  %v112_v15 = vld [vmem:[%s400_s3 + $0x30] sm:$0xff] }
   0x4   :  { %270 = vmatpush3.bf16.msra.mxu0 %v269_v4  ;;  %v110_v12 = vld [vmem:[%s400_s3 + $0x20] sm:$0xff]  ;;  %v113_v16 = vld [vmem:[%s400_s3 + $0x38] sm:$0xff]  ;;  %v115_v19 = vld [vmem:[%s400_s3 + $0x48] sm:$0xff] }
   0x5   :  { %273 = vmatpush3.bf16.msra.mxu1 %v272_v8  ;;  %v278_v14 = vpack.c.bf16 %v111_v13, %v110_v12  ;;  %v281_v17 = vpack.c.bf16 %v113_v16, %v112_v15  ;;  %v114_v18 = vld [vmem:[%s400_s3 + $0x40] sm:$0xff]  ;;  %v116_v21 = vld [vmem:[%s400_s3 + $0x50] sm:$0xff]  ;;  %v117_v22 = vld [vmem:[%s400_s3 + $0x58] sm:$0xff] }
   0x6   :  { %274 = vmatprep.subr.bf16.mxu1 %v300_v0  ;;  %v284_v20 = vpack.c.bf16 %v115_v19, %v114_v18  ;;  %v287_v23 = vpack.c.bf16 %v117_v22, %v116_v21  ;;  %v118_v24 = vld [vmem:[%s400_s3 + $0x60] sm:$0xff]  ;;  %v119_v25 = vld [vmem:[%s400_s3 + $0x68] sm:$0xff]  ;;  %v120_v27 = vld [vmem:[%s400_s3 + $0x70] sm:$0xff] }
   0x7   :  { %231 = vmatmul.mubr.msk.f32.vlgmr.msra.gmra.mrb[0].mxu0 %vm31_vm1, %v21_v10  ;;  %v290_v26 = vpack.c.bf16 %v119_v25, %v118_v24  ;;  %v121_v28 = vld [vmem:[%s400_s3 + $0x78] sm:$0xff]  ;;  %v204_v30 = vld [vmem:[%s402_s2] ss:$0 sm:$0xff] }
   0x8   :  { %v293_v29 = vpack.c.bf16 %v121_v28, %v120_v27 }
   0x9   :  { %276 = vmatpush3.bf16.msra.mxu1 %v275_v11 }
   0xa   :  { %277 = vmatprep.subr.bf16.mxu1 %v300_v0 }
   0xd   :  { %279 = vmatpush3.bf16.msra.mxu1 %v278_v14 }
   0xe   :  { %280 = vmatprep.subr.bf16.mxu1 %v300_v0 }
  0x11   :  { %282 = vmatpush3.bf16.msra.mxu1 %v281_v17 }
  0x12   :  { %283 = vmatprep.subr.bf16.mxu1 %v300_v0 }
  0x15   :  { %285 = vmatpush3.bf16.msra.mxu1 %v284_v20 }
  0x16   :  { %286 = vmatprep.subr.bf16.mxu1 %v300_v0 }
  0x19   :  { %288 = vmatpush3.bf16.msra.mxu1 %v287_v23 }
  0x1a   :  { %289 = vmatprep.subr.bf16.mxu1 %v300_v0 }
  0x1d   :  { %291 = vmatpush3.bf16.msra.mxu1 %v290_v26 }
  0x1e   :  { %292 = vmatprep.subr.bf16.mxu1 %v300_v0 }
  0x21   :  { %294 = vmatpush3.bf16.msra.mxu1 %v293_v29 }
  0xda   :  { %v101_v31 = vpop.f32.mrb[0].mxu0 }
  0xdb   :  { %v102_v32 = vadd.f32 %v204_v30, %v101_v31  ;;  %v232_v33 = vpop.f32.mrb[1].mxu0 }
  0xdd   :  { %v105_v34 = vmax.f32 %v102_v32, 0.0 }
  0xdf   :  { %266 = vmatmul.mubr.f32.vlgmr.msra.gmra.mrb[0].mxu1 %v105_v34 }
 0x1b2   :  { %v190_v36 = vpop.f32.mrb[0].mxu1 }
 0x1b3   :  { %v191_v37 = vadd.f32 %v190_v36, %v123_v35  ;;  %v267_v38 = vpop.f32.mrb[1].mxu1 }
 0x1b5   :  { %v194_v39 = vmul.f32 0.5, %v191_v37 }
 0x1b7   :  { %298 = vtanh.f32 %v194_v39 }
 0x1c1   :  { %v299_v40 = vpop.eup %298 }
 0x1c2   :  { %v196_v41 = vadd.f32 1.0, %v299_v40 }
 0x1c4   :  { %v197_v42 = vmul.f32 0.5, %v196_v41 }
 0x1c6   :  { %199 = vst.msk [vmem:[%s404_s5] sm:$0xff] %vm198_vm2, %v197_v42 }

</bundles_post_ra>
